<compile_context>
chip_gen: v6e
topology: v6e:2x2x1
jax: 0.10.0
libtpu: 0.0.40
codegen_flags: <defaults>
</compile_context>

<pallas_src>
import jax
import jax.numpy as jnp
from jax import lax
from jax.experimental import pallas as pl
from jax.experimental.pallas import tpu as pltpu

_LANE = 128
_VMEM_LIMIT_BYTES = 32 * 1024 * 1024     # explicit scoped-VMEM limit (v7x-safe)
_VMEM_BUDGET_BYTES = 16 * 1024 * 1024    # target working set (~half of scoped)


def _round_up(v, m):
    return pl.cdiv(v, m) * m


def _num_tensorcores_per_chip():
    """2 on dual-TensorCore chips (v7x); 1 on v5e/v6e.  Conservative fallback."""
    try:
        info = pltpu.get_tpu_info()
        for name in ("num_cores", "core_count", "num_tensorcores",
                     "tensorcores_per_chip"):
            v = getattr(info, name, None)
            if isinstance(v, int) and v > 0:
                return v
    except Exception:
        pass
    try:
        kind = getattr(jax.devices()[0], "device_kind", "").lower()
        if "v7" in kind:
            return 2
    except Exception:
        pass
    return 1


def _choose_row_tile(batch_per_block, hw, K, Fp, NCp):
    """Largest row tile TR that (a) exactly tiles batch_per_block*hw rows,
    (b) aligns with whole batch elements (or divides hw), and (c) fits the
    VMEM budget with double-buffered xcol + resident weights + f32 temps."""
    resident = (K * Fp + Fp * NCp) * 2 + (Fp + NCp) * 4 \
        + batch_per_block * Fp * 4
    per_row = 2 * K * 2 + Fp * 4        # 2x-buffered bf16 xcol rows + f32 acc
    tr_max = max(8, (_VMEM_BUDGET_BYTES - resident) // per_row)
    rows = batch_per_block * hw
    if tr_max >= rows:
        return rows, 1                          # whole m-block in one row tile
    if tr_max >= hw:
        bpt = min(batch_per_block, tr_max // hw)
        while batch_per_block % bpt:            # exact cover of the block
            bpt -= 1
        return bpt * hw, batch_per_block // bpt
    # TR < HW: largest multiple-of-8 divisor of hw that fits the budget.
    # TODO(synk): handle hw not divisible by 8 (row padding) if ever needed.
    tr = 8
    for d in range(8, hw + 1, 8):
        if hw % d == 0 and d <= tr_max:
            tr = d
    return tr, rows // tr


def _make_kernel(batch_per_block, hw, tr, Fp, num_row_tiles):
    inv_hw = 1.0 / float(hw)

    def kernel(xcol_ref, wconv_ref, bconv_ref, wfc_ref, bfc_ref, out_ref,
               feat_acc):
        # xcol_ref : (tr, K)                    bf16  im2col row tile (streamed)
        # wconv_ref: (K, Fp)                    bf16  resident conv weight
        # bconv_ref: (1, Fp)                    f32
        # wfc_ref  : (Fp, NCp)                  bf16  resident FC weight
        # bfc_ref  : (1, NCp)                   f32
        # out_ref  : (1, batch_per_block, NCp)  f32
        # feat_acc : (batch_per_block, Fp)      f32   running GAP sums
        r = pl.program_id(1)

        if tr < hw:         # partial-sum path needs a zeroed accumulator
            @pl.when(r == 0)
            def _():
                feat_acc[...] = jnp.zeros_like(feat_acc)

        # 3x3 conv as one MXU matmul over the im2col row tile, + bias + ReLU.
        acc = jnp.dot(xcol_ref[...], wconv_ref[...],
                      preferred_element_type=jnp.float32)            # (tr, Fp)
        acc = jnp.maximum(acc + bconv_ref[...], 0.0)

        # Global-average-pool: accumulate per-batch-element row sums.
        if tr >= hw:                      # tile covers whole batch elements
            bpt = tr // hw
            part = acc.reshape(bpt, hw, Fp).sum(axis=1)              # (bpt, Fp)
            if num_row_tiles == 1:
                feat_acc[...] = part
            else:
                feat_acc[pl.ds(r * bpt, bpt), :] = part
        else:                             # several tiles per batch element
            b = r // (hw // tr)
            feat_acc[pl.ds(b, 1), :] += acc.sum(axis=0, keepdims=True)

        # Finalize: single 1/HW scale + one batched FC for this m-block.
        @pl.when(r == num_row_tiles - 1)
        def _():
            feat = feat_acc[...] * inv_hw                            # GAP
            logits = jnp.dot(feat.astype(jnp.bfloat16), wfc_ref[...],
                             preferred_element_type=jnp.float32) + bfc_ref[...]
            out_ref[0] = logits.astype(out_ref.dtype)

    return kernel


def just_extraction_forward(x_nchw, w_conv, b_conv, w_fc, b_fc):
    """x_nchw: (B, Cin, H, W) f32 -> logits (B, num_classes) f32."""
    B, Cin, H, W = x_nchw.shape
    F = w_conv.shape[-1]
    NC = w_fc.shape[-1]
    HW = H * W
    K = 9 * Cin
    # Lane padding only for the tiny resident weights (xcol keeps K unpadded).
    Fp = _round_up(F, 256) if F >= 256 else _round_up(F, _LANE)
    NCp = _round_up(NC, _LANE)

    # ---- im2col via one fused patch-extraction conv -------------------------
    # conv_general_dilated_patches emits channels ordered (cin, ky, kx) with
    # cin slowest; the conv weight is permuted to match below.
    patches = lax.conv_general_dilated_patches(
        x_nchw, filter_shape=(3, 3), window_strides=(1, 1), padding="SAME")
    xcol = jnp.transpose(patches, (0, 2, 3, 1)).reshape(B * HW, K)
    xcol = xcol.astype(jnp.bfloat16)

    wc = jnp.transpose(w_conv, (2, 0, 1, 3)).reshape(K, F)      # (cin,ky,kx)-maj
    wc = jnp.pad(wc, ((0, 0), (0, Fp - F))).astype(jnp.bfloat16)
    bc = jnp.pad(b_conv.reshape(1, F), ((0, 0), (0, Fp - F))).astype(jnp.float32)
    wf = jnp.pad(w_fc, ((0, Fp - F), (0, NCp - NC))).astype(jnp.bfloat16)
    bf = jnp.pad(b_fc.reshape(1, NC), ((0, 0), (0, NCp - NC))).astype(jnp.float32)

    # Split the batch across TensorCores only when the chip actually has two.
    num_m_blocks = 2 if (_num_tensorcores_per_chip() >= 2 and B % 2 == 0) else 1
    batch_per_block = B // num_m_blocks
    tr, num_row_tiles = _choose_row_tile(batch_per_block, HW, K, Fp, NCp)

    kernel = _make_kernel(batch_per_block, HW, tr, Fp, num_row_tiles)

    grid_spec = pltpu.PrefetchScalarGridSpec(
        num_scalar_prefetch=0,
        grid=(num_m_blocks, num_row_tiles),
        in_specs=[
            pl.BlockSpec((tr, K), lambda m, r: (m * num_row_tiles + r, 0)),
            pl.BlockSpec((K, Fp), lambda m, r: (0, 0)),
            pl.BlockSpec((1, Fp), lambda m, r: (0, 0)),
            pl.BlockSpec((Fp, NCp), lambda m, r: (0, 0)),
            pl.BlockSpec((1, NCp), lambda m, r: (0, 0)),
        ],
        out_specs=pl.BlockSpec((1, batch_per_block, NCp),
                               lambda m, r: (m, 0, 0)),
        scratch_shapes=[pltpu.VMEM((batch_per_block, Fp), jnp.float32)],
    )

    # Advisory cost based on unpadded K / real work.
    flops = 2 * B * HW * K * F + 2 * B * F * NC
    bytes_accessed = (xcol.size * 2 + wc.size * 2 + wf.size * 2
                      + bc.size * 4 + bf.size * 4
                      + num_m_blocks * batch_per_block * NCp * 4)

    out = pl.pallas_call(
        kernel,
        out_shape=jax.ShapeDtypeStruct((num_m_blocks, batch_per_block, NCp),
                                       jnp.float32),
        grid_spec=grid_spec,
        compiler_params=pltpu.CompilerParams(
            dimension_semantics=("parallel", "arbitrary"),
            vmem_limit_bytes=_VMEM_LIMIT_BYTES),
        cost_estimate=pl.CostEstimate(
            flops=flops, transcendentals=0, bytes_accessed=bytes_accessed),
    )(xcol, wc, bc, wf, bf)

    return out.reshape(B, NCp)[:, :NC]


def _init_params(key, Cin, F, NC):
    k1, k2, k3, k4 = jax.random.split(key, 4)
    w_conv = jax.random.normal(k1, (3, 3, Cin, F), jnp.float32) * 0.1
    b_conv = jax.random.normal(k2, (1, F), jnp.float32) * 0.01
    w_fc = jax.random.normal(k3, (F, NC), jnp.float32) * 0.1
    b_fc = jax.random.normal(k4, (1, NC), jnp.float32) * 0.01
    return w_conv, b_conv, w_fc, b_fc


if __name__ == "__main__":
    # Small shapes consistent with the module's image-classifier forward.
    B, Cin, H, W = 2, 4, 16, 16
    in_features = 32          # self.in_features of the synthetic backbone
    num_classes = 8

    key = jax.random.PRNGKey(0)
    kx, kp = jax.random.split(key)
    x = jax.random.normal(kx, (B, Cin, H, W), jnp.float32)
    w_conv, b_conv, w_fc, b_fc = _init_params(kp, Cin, in_features, num_classes)

    out = just_extraction_forward(x, w_conv, b_conv, w_fc, b_fc)
    out = jax.block_until_ready(out)

    # Pure-JAX f32 reference of the same synthetic backbone.  The kernel uses
    # bf16 matmul operands with f32 accumulation, so tolerance is loosened.
    x_nhwc = jnp.transpose(x, (0, 2, 3, 1))
    conv = lax.conv_general_dilated(
        x_nhwc, w_conv, window_strides=(1, 1), padding="SAME",
        dimension_numbers=("NHWC", "HWIO", "NHWC"))
    ref = jnp.maximum(conv + b_conv[0], 0.0).mean(axis=(1, 2)) @ w_fc + b_fc[0]
    assert out.shape == (B, num_classes)
    assert jnp.allclose(out, ref, atol=2e-2, rtol=2e-2), float(
        jnp.max(jnp.abs(out - ref)))

    print("KERNEL_OK")
</pallas_src>

<mosaic_0001>
module attributes {stable_mosaic.version = 11 : i64} {
  func.func @kernel(%arg0: i32, %arg1: i32, %arg2: memref<512x36xbf16, #tpu.memory_space<vmem>>, %arg3: memref<36x128xbf16, #tpu.memory_space<vmem>>, %arg4: memref<1x128xf32, #tpu.memory_space<vmem>>, %arg5: memref<128x128xbf16, #tpu.memory_space<vmem>>, %arg6: memref<1x128xf32, #tpu.memory_space<vmem>>, %arg7: memref<1x2x128xf32, #tpu.memory_space<vmem>>, %arg8: memref<2x128xf32, #tpu.memory_space<vmem>>) attributes {dimension_semantics = [#tpu.dimension_semantics<parallel>, #tpu.dimension_semantics<arbitrary>], iteration_bounds = array<i64: 1, 1>, scalar_prefetch = 0 : i64, scratch_operands = 1 : i64, tpu.core_type = #tpu.core_type<tc>, window_params = [{transform_indices = @transform_0, window_bounds = array<i64: 512, 36>}, {pipeline_mode = #tpu.pipeline_mode<synchronous>, transform_indices = @transform_1, window_bounds = array<i64: 36, 128>}, {pipeline_mode = #tpu.pipeline_mode<synchronous>, transform_indices = @transform_2, window_bounds = array<i64: 1, 128>}, {pipeline_mode = #tpu.pipeline_mode<synchronous>, transform_indices = @transform_3, window_bounds = array<i64: 128, 128>}, {pipeline_mode = #tpu.pipeline_mode<synchronous>, transform_indices = @transform_4, window_bounds = array<i64: 1, 128>}, {transform_indices = @transform_5, window_bounds = array<i64: 1, 2, 128>}]} {
    %c0 = arith.constant 0 : index
    %c0_0 = arith.constant 0 : index
    %0 = vector.load %arg2[%c0, %c0_0] : memref<512x36xbf16, #tpu.memory_space<vmem>>, vector<512x36xbf16>
    %c0_1 = arith.constant 0 : index
    %c0_2 = arith.constant 0 : index
    %1 = vector.load %arg3[%c0_1, %c0_2] : memref<36x128xbf16, #tpu.memory_space<vmem>>, vector<36x128xbf16>
    %cst = arith.constant dense<0.000000e+00> : vector<512x128xf32>
    %2 = tpu.matmul %0, %1, %cst {dimension_numbers = #tpu.dot_dimension_numbers<[1], [0], [0], [1], [0, 0, 1, 1], [], []>} : vector<512x36xbf16>, vector<36x128xbf16>, vector<512x128xf32> -> vector<512x128xf32>
    %c0_3 = arith.constant 0 : index
    %c0_4 = arith.constant 0 : index
    %3 = vector.load %arg4[%c0_3, %c0_4] : memref<1x128xf32, #tpu.memory_space<vmem>>, vector<1x128xf32>
    %4 = vector.broadcast %3 : vector<1x128xf32> to vector<512x128xf32>
    %5 = arith.addf %2, %4 : vector<512x128xf32>
    %cst_5 = arith.constant 0.000000e+00 : f32
    %6 = vector.broadcast %cst_5 : f32 to vector<512x128xf32>
    %7 = arith.maximumf %5, %6 : vector<512x128xf32>
    %8 = vector.shape_cast %7 : vector<512x128xf32> to vector<2x256x128xf32>
    %cst_6 = arith.constant dense<0.000000e+00> : vector<2x128xf32>
    %9 = vector.multi_reduction <add>, %8, %cst_6 [1] : vector<2x256x128xf32> to vector<2x128xf32>
    %c0_7 = arith.constant 0 : index
    %c0_8 = arith.constant 0 : index
    %10 = vector.load %arg8[%c0_7, %c0_8] : memref<2x128xf32, #tpu.memory_space<vmem>>, vector<2x128xf32>
    tpu.vector_store %arg8[%c0_7, %c0_8], %9 {strides = array<i32>} : memref<2x128xf32, #tpu.memory_space<vmem>>, vector<2x128xf32>,
    %c0_i32 = arith.constant 0 : i32
    %11 = arith.cmpi eq, %arg1, %c0_i32 : i32
    %12 = arith.extui %11 : i1 to i32
    %c0_i32_9 = arith.constant 0 : i32
    %13 = arith.cmpi ne, %12, %c0_i32_9 : i32
    scf.if %13 {
      %c0_10 = arith.constant 0 : index
      %c0_11 = arith.constant 0 : index
      %14 = vector.load %arg8[%c0_10, %c0_11] : memref<2x128xf32, #tpu.memory_space<vmem>>, vector<2x128xf32>
      %cst_12 = arith.constant 3.906250e-03 : f32
      %15 = vector.broadcast %cst_12 : f32 to vector<2x128xf32>
      %16 = arith.mulf %14, %15 : vector<2x128xf32>
      %17 = arith.truncf %16 : vector<2x128xf32> to vector<2x128xbf16>
      %c0_13 = arith.constant 0 : index
      %c0_14 = arith.constant 0 : index
      %18 = vector.load %arg5[%c0_13, %c0_14] : memref<128x128xbf16, #tpu.memory_space<vmem>>, vector<128x128xbf16>
      %cst_15 = arith.constant dense<0.000000e+00> : vector<2x128xf32>
      %19 = tpu.matmul %17, %18, %cst_15 {dimension_numbers = #tpu.dot_dimension_numbers<[1], [0], [0], [1], [0, 0, 1, 1], [], []>} : vector<2x128xbf16>, vector<128x128xbf16>, vector<2x128xf32> -> vector<2x128xf32>
      %c0_16 = arith.constant 0 : index
      %c0_17 = arith.constant 0 : index
      %20 = vector.load %arg6[%c0_16, %c0_17] : memref<1x128xf32, #tpu.memory_space<vmem>>, vector<1x128xf32>
      %21 = vector.broadcast %20 : vector<1x128xf32> to vector<2x128xf32>
      %22 = arith.addf %19, %21 : vector<2x128xf32>
      %c0_18 = arith.constant 0 : index
      %c0_19 = arith.constant 0 : index
      %c0_20 = arith.constant 0 : index
      %23 = vector.load %arg7[%c0_18, %c0_19, %c0_20] : memref<1x2x128xf32, #tpu.memory_space<vmem>>, vector<1x2x128xf32>
      %24 = vector.shape_cast %23 : vector<1x2x128xf32> to vector<2x128xf32>
      %25 = vector.shape_cast %22 : vector<2x128xf32> to vector<1x2x128xf32>
      tpu.vector_store %arg7[%c0_18, %c0_19, %c0_20], %25 {strides = array<i32>} : memref<1x2x128xf32, #tpu.memory_space<vmem>>, vector<1x2x128xf32>,
    } else {
    }
    return
  }
  func.func @transform_0(%arg0: i32, %arg1: i32) -> (i32, i32) {
    %c1_i32 = arith.constant 1 : i32
    %0 = arith.muli %arg0, %c1_i32 : i32
    %1 = arith.addi %0, %arg1 : i32
    %c0_i32 = arith.constant 0 : i32
    %c0_i32_0 = arith.constant 0 : i32
    return %1, %c0_i32 : i32, i32
  }
  func.func @transform_1(%arg0: i32, %arg1: i32) -> (i32, i32) {
    %c0_i32 = arith.constant 0 : i32
    %c0_i32_0 = arith.constant 0 : i32
    %c0_i32_1 = arith.constant 0 : i32
    return %c0_i32, %c0_i32_0 : i32, i32
  }
  func.func @transform_2(%arg0: i32, %arg1: i32) -> (i32, i32) {
    %c0_i32 = arith.constant 0 : i32
    %c0_i32_0 = arith.constant 0 : i32
    %c0_i32_1 = arith.constant 0 : i32
    return %c0_i32, %c0_i32_0 : i32, i32
  }
  func.func @transform_3(%arg0: i32, %arg1: i32) -> (i32, i32) {
    %c0_i32 = arith.constant 0 : i32
    %c0_i32_0 = arith.constant 0 : i32
    %c0_i32_1 = arith.constant 0 : i32
    return %c0_i32, %c0_i32_0 : i32, i32
  }
  func.func @transform_4(%arg0: i32, %arg1: i32) -> (i32, i32) {
    %c0_i32 = arith.constant 0 : i32
    %c0_i32_0 = arith.constant 0 : i32
    %c0_i32_1 = arith.constant 0 : i32
    return %c0_i32, %c0_i32_0 : i32, i32
  }
  func.func @transform_5(%arg0: i32, %arg1: i32) -> (i32, i32, i32) {
    %c0_i32 = arith.constant 0 : i32
    %c0_i32_0 = arith.constant 0 : i32
    %c0_i32_1 = arith.constant 0 : i32
    return %arg0, %c0_i32, %c0_i32_0 : i32, i32, i32
  }
}

</mosaic_0001>

<bundles_post_ra>
// kernel: tpu_custom_call.1
= control target key start
LH: loop header
LB: loop body
LE: loop exit
PB: predicated region body
PF: predicated region fallthrough
CT: control target
= control target key end

     0   :  { %vm392_vm0 = vcmask 1041408   ;;  %vm295_vm1 = vcmask 293888   ;;  %s1576_s0 = inlined_call_operand.vmem [shape: bf16[512,36], index: 0, kind: input, shape index: {}]   ;;  %s1577_s1 = inlined_call_operand.vmem [shape: bf16[36,128], index: 1, kind: input, shape index: {}]   ;;  %s1578_s2 = inlined_call_operand.vmem [shape: f32[1,128], index: 2, kind: input, shape index: {}]   ;;  %s1579_s3 = inlined_call_operand.vmem [shape: bf16[128,128], index: 3, kind: input, shape index: {}]   ;;  %s1580_s4 = inlined_call_operand.vmem [shape: f32[1,128], index: 4, kind: input, shape index: {}]   ;;  %s1581_s5 = inlined_call_operand.hbm [shape: f32[1,2,128], index: 5, kind: output, shape index: {}]  }
   0x1   :  { %v1190_v0 = vld [vmem:[%s1577_s1 + $0x10] ss:$0 sps:$4 sm:$0x33]   ;;  %v1191_v1 = vld [vmem:[%s1577_s1 + $0x8] sm:$0xff]   ;;  %v1193_v3 = vld [vmem:[%s1576_s0] sm:$0xff]  }
   0x2   :  { %1185 = vmatprep.subr.msk.bf16.mxu0 %vm392_vm0, %v1190_v0  ;;  %v394_v2 = vsel %vm392_vm0, %v1190_v0, 0  ;;  %1186 = vmatprep.subr.msk.bf16.mxu1 %vm392_vm0, %v1190_v0  ;;  %v1192_v4 = vld [vmem:[%s1577_s1] sm:$0xff]   ;;  %v1194_v5 = vld [vmem:[%s1576_s0 + $0x8] sm:$0xff]   ;;  %v1195_v6 = vld [vmem:[%s1576_s0 + $0x10] sm:$0xff]  }
   0x3   :  { %1090 = vmatpush3.bf16.msra.mxu0 %v394_v2  ;;  %1182 = vmatpush3.bf16.msra.mxu1 %v394_v2  ;;  %v1196_v7 = vld [vmem:[%s1576_s0 + $0x18] sm:$0xff]   ;;  %v1197_v8 = vld [vmem:[%s1576_s0 + $0x20] sm:$0xff]   ;;  %v1211_v9 = vld [vmem:[%s1576_s0 + $0x90] sm:$0xff]  }
   0x4   :  { %1091 = vmatprep.subr.bf16.mxu0 %v1191_v1  ;;  %1180 = vmatprep.subr.bf16.mxu1 %v1191_v1  ;;  %v1212_v10 = vld [vmem:[%s1576_s0 + $0x98] sm:$0xff]   ;;  %v1213_v11 = vld [vmem:[%s1576_s0 + $0xa0] sm:$0xff]   ;;  %v1198_v12 = vld [vmem:[%s1576_s0 + $0x28] sm:$0xff]  }
   0x5   :  { %1095 = vmatprep.mubr.msk.bf16.mxu0 %vm295_vm1, %v1193_v3  ;;  %1131 = vmatprep.mubr.msk.bf16.mxu1 %vm295_vm1, %v1211_v9  ;;  %v1199_v13 = vld [vmem:[%s1576_s0 + $0x30] sm:$0xff]   ;;  %v1214_v14 = vld [vmem:[%s1576_s0 + $0xa8] sm:$0xff]   ;;  %v1200_v16 = vld [vmem:[%s1576_s0 + $0x38] sm:$0xff]  }
   0x6   :  { %v1215_v15 = vld [vmem:[%s1576_s0 + $0xb0] sm:$0xff]   ;;  %v1201_v17 = vld [vmem:[%s1576_s0 + $0x40] sm:$0xff]   ;;  %v1216_v18 = vld [vmem:[%s1576_s0 + $0xb8] sm:$0xff]  }
   0x7   :  { %1092 = vmatpush3.bf16.msra.mxu0 %v1191_v1  ;;  %1183 = vmatpush3.bf16.msra.mxu1 %v1191_v1  ;;  %v1217_v19 = vld [vmem:[%s1576_s0 + $0xc0] sm:$0xff]  }
   0x8   :  { %1093 = vmatprep.subr.bf16.mxu0 %v1192_v4  ;;  %1181 = vmatprep.subr.bf16.mxu1 %v1192_v4 }
   0xb   :  { %1094 = vmatpush3.bf16.msra.mxu0 %v1192_v4  ;;  %1184 = vmatpush3.bf16.msra.mxu1 %v1192_v4 }
   0xe   :  { %1096 = vmatmul.mubr.msk.bf16.vlgmr.msra.gmra.mxu0 %vm295_vm1, %v1194_v5  ;;  %1132 = vmatmul.mubr.msk.bf16.vlgmr.msra.gmra.mxu1 %vm295_vm1, %v1212_v10 }
   0xf   :  { %1099 = vmatprep.mubr.msk.bf16.mxu0 %vm295_vm1, %v1195_v6  ;;  %1135 = vmatprep.mubr.msk.bf16.mxu1 %vm295_vm1, %v1213_v11 }
  0x16   :  { %1100 = vmatmul.mubr.msk.bf16.gmra.mxu0 %vm295_vm1, %v1196_v7  ;;  %1136 = vmatmul.mubr.msk.bf16.gmra.mxu1 %vm295_vm1, %v1214_v14 }
  0x17   :  { %1103 = vmatprep.mubr.msk.bf16.mxu0 %vm295_vm1, %v1197_v8  ;;  %1139 = vmatprep.mubr.msk.bf16.mxu1 %vm295_vm1, %v1215_v15 }
  0x1e   :  { %1104 = vmatmul.mubr.msk.bf16.gmra.mxu0 %vm295_vm1, %v1198_v12  ;;  %1140 = vmatmul.mubr.msk.bf16.gmra.mxu1 %vm295_vm1, %v1216_v18 }
  0x1f   :  { %1107 = vmatprep.mubr.msk.bf16.mxu0 %vm295_vm1, %v1199_v13 }
  0x26   :  { %1108 = vmatmul.mubr.msk.bf16.gmra.mxu0 %vm295_vm1, %v1200_v16 }
  0x27   :  { %1111 = vmatprep.mubr.msk.bf16.mxu0 %vm295_vm1, %v1201_v17 }
  0x28   :  { %10 = vsyncpa [#allocation4], 0  ;;  %1143 = vmatprep.mubr.msk.bf16.mxu1 %vm295_vm1, %v1217_v19  ;;  %v1202_v20 = vld [vmem:[%s1576_s0 + $0x48] sm:$0xff]   ;;  %v1203_v21 = vld [vmem:[%s1576_s0 + $0x50] sm:$0xff]   ;;  %v1255_v37 = vmov 0.0   ;;  %vm1256_vm2 = vmmov 0  }
  0x29   :  { %v1218_v22 = vld [vmem:[%s1576_s0 + $0xc8] sm:$0xff]   ;;  %v1219_v23 = vld [vmem:[%s1576_s0 + $0xd0] sm:$0xff]   ;;  %v1204_v24 = vld [vmem:[%s1576_s0 + $0x58] sm:$0xff]   ;;  %1159 = vmatprep.subr.bf16.mxu1 %v1255_v37  ;;  %vm825_vm3 = vcmask 1041409   ;;  %s1257_s27 = smov [#allocation3]  }
  0x2a   :  { %1144 = vmatmul.mubr.msk.bf16.gmra.mxu1 %vm295_vm1, %v1218_v22  ;;  %v1205_v25 = vld [vmem:[%s1576_s0 + $0x60] sm:$0xff]   ;;  %v1220_v26 = vld [vmem:[%s1576_s0 + $0xd8] sm:$0xff]   ;;  %v1206_v28 = vld [vmem:[%s1576_s0 + $0x68] sm:$0xff]   ;;  %s954_s28 = sshll.u32 %s1257_s27, 4  ;;  %s955_s28 = int_to_ptr.vmem [resolvable:$true] %s954_s28 }
  0x2b   :  { %1147 = vmatprep.mubr.msk.bf16.mxu1 %vm295_vm1, %v1219_v23  ;;  %v1221_v27 = vld [vmem:[%s1576_s0 + $0xe0] sm:$0xff]   ;;  %v1207_v29 = vld [vmem:[%s1576_s0 + $0x70] sm:$0xff]   ;;  %v1222_v30 = vld [vmem:[%s1576_s0 + $0xe8] sm:$0xff]   ;;  %s1233_s29 = scalar_lea.vmem %s955_s28, 32  ;;  %p1238_p1 = scmp.lt.s32.totalorder %s955_s28, %s955_s28 }
  0x2c   :  { %v1223_v31 = vld [vmem:[%s1576_s0 + $0xf0] sm:$0xff]   ;;  %v1208_v32 = vld [vmem:[%s1576_s0 + $0x78] sm:$0xff]   ;;  %v1209_v33 = vld [vmem:[%s1576_s0 + $0x80] sm:$0xff]   ;;  %p1234_p0 = scmp.ne.s32.totalorder %s955_s28, %s1233_s29  ;;  %p1239_p2 = scmp.lt.s32.totalorder %s1233_s29, %s1233_s29 }
  0x2d   :  { %v1224_v34 = vld [vmem:[%s1576_s0 + $0xf8] sm:$0xff]   ;;  %v1210_v35 = vld [vmem:[%s1576_s0 + $0x88] sm:$0xff]   ;;  %v1226_v38 = vld [vmem:[%s1579_s3 + $0x30] sm:$0xff]  }
  0x2e   :  { %1112 = vmatmul.mubr.msk.bf16.gmra.mxu0 %vm295_vm1, %v1202_v20  ;;  %v1225_v36 = vld [vmem:[%s1579_s3 + $0x38] sm:$0xff]   ;;  %v1437_v41 = vld [vmem:[%s1578_s2] ss:$0 sm:$0xff]  ;;  %v1227_v51 = vld [vmem:[%s1579_s3 + $0x28] sm:$0xff]   ;;  %p1240_p3 = por %p1239_p2, %p1238_p1 }
  0x2f   :  { %1115 = vmatprep.mubr.msk.bf16.mxu0 %vm295_vm1, %v1203_v21  ;;  %1160 = vmatpush3.bf16.msra.mxu1 %v1225_v36  ;;  %v1228_v59 = vld [vmem:[%s1579_s3 + $0x20] sm:$0xff]   ;;  %v1229_v6 = vld [vmem:[%s1579_s3 + $0x18] sm:$0xff]   ;;  %v1230_v15 = vld [vmem:[%s1579_s3 + $0x10] sm:$0xff]  }
  0x30   :  { %1161 = vmatprep.subr.bf16.mxu1 %v1255_v37  ;;  %v1231_v22 = vld [vmem:[%s1579_s3 + $0x8] sm:$0xff]   ;;  %p1241_p4 = pnand %p1240_p3, %p1234_p0 }
  0x32   :  { %1148 = vmatmul.mubr.msk.bf16.gmra.mxu1 %vm295_vm1, %v1220_v26 }
  0x33   :  { %1151 = vmatprep.mubr.msk.bf16.mxu1 %vm295_vm1, %v1221_v27  ;;  %1162 = vmatpush3.bf16.msra.mxu1 %v1226_v38 }
  0x34   :  { %1163 = vmatprep.subr.bf16.mxu1 %v1255_v37 }
  0x36   :  { %1116 = vmatmul.mubr.msk.bf16.gmra.mxu0 %vm295_vm1, %v1204_v24 }
  0x37   :  { %1119 = vmatprep.mubr.msk.bf16.mxu0 %vm295_vm1, %v1205_v25  ;;  %1164 = vmatpush3.bf16.msra.mxu1 %v1227_v51 }
  0x38   :  { %1165 = vmatprep.subr.bf16.mxu1 %v1255_v37 }
  0x3a   :  { %1152 = vmatmul.mubr.msk.bf16.gmra.mxu1 %vm295_vm1, %v1222_v30 }
  0x3b   :  { %1155 = vmatprep.mubr.msk.bf16.mxu1 %vm295_vm1, %v1223_v31  ;;  %1166 = vmatpush3.bf16.msra.mxu1 %v1228_v59 }
  0x3c   :  { %1167 = vmatprep.subr.bf16.mxu1 %v1255_v37 }
  0x3e   :  { %1120 = vmatmul.mubr.msk.bf16.gmra.mxu0 %vm295_vm1, %v1206_v28 }
  0x3f   :  { %1123 = vmatprep.mubr.msk.bf16.mxu0 %vm295_vm1, %v1207_v29  ;;  %1168 = vmatpush3.bf16.msra.mxu1 %v1229_v6 }
  0x40   :  { %1169 = vmatprep.subr.bf16.mxu1 %v1255_v37 }
  0x42   :  { %1156 = vmatmul.mubr.msk.bf16.gmra.mxu1 %vm295_vm1, %v1224_v34 }
  0x43   :  { %1170 = vmatpush3.bf16.msra.mxu1 %v1230_v15  ;;  %1175 = vmatprep.mubr.msk.bf16.mxu1 %vm1256_vm2, %v1255_v37 }
  0x44   :  { %1171 = vmatprep.subr.bf16.mxu1 %v1255_v37 }
  0x46   :  { %1124 = vmatmul.mubr.msk.bf16.gmra.mxu0 %vm295_vm1, %v1208_v32  ;;  %v1232_v32 = vld [vmem:[%s1579_s3] sm:$0xff]  }
  0x47   :  { %1127 = vmatprep.mubr.msk.bf16.mxu0 %vm295_vm1, %v1209_v33  ;;  %1172 = vmatpush3.bf16.msra.mxu1 %v1231_v22 }
  0x48   :  { %1173 = vmatprep.subr.bf16.mxu1 %v1255_v37 }
  0x4b   :  { %1174 = vmatpush3.bf16.msra.mxu1 %v1232_v32 }
  0x4e   :  { %1128 = vmatmul.mubr.msk.bf16.gmra.mxu0 %vm295_vm1, %v1210_v35 }
  0xce   :  { %v1097_v39 = vpop.f32.mrf.mxu0  ;;  %v1451_v61 = vpop.f32.mrf.mxu1 }
  0xcf   :  { %v439_v45 = vadd.f32 %v1097_v39, %v1437_v41 }
  0xd0   :  { %v430_v40 = vpop.f32.mrf.mxu0  ;;  %v1460_v8 = vpop.f32.mrf.mxu1 }
  0xd1   :  { %v431_v43 = vadd.f32 %v1437_v41, %v430_v40  ;;  %v687_v53 = vmax.f32 %v439_v45, 0.0 }
  0xd2   :  { %v1098_v42 = vpop.f32.mrf.mxu0  ;;  %v1467_v17 = vpop.f32.mrf.mxu1 }
  0xd3   :  { %v685_v48 = vmax.f32 %v431_v43, 0.0  ;;  %v442_v49 = vadd.f32 %v1098_v42, %v1437_v41 }
  0xd4   :  { %v433_v44 = vpop.f32.mrf.mxu0  ;;  %v1477_v28 = vpop.f32.mrf.mxu1 }
  0xd5   :  { %v434_v46 = vadd.f32 %v1437_v41, %v433_v44  ;;  %v688_v57 = vmax.f32 %v442_v49, 0.0 }
  0xd6   :  { %v1101_v47 = vpop.f32.mrf.mxu0  ;;  %v1484_v38 = vpop.f32.mrf.mxu1 }
  0xd7   :  { %v686_v50 = vmax.f32 %v434_v46, 0.0  ;;  %v455_v62 = vadd.f32 %v1101_v47, %v1437_v41 }
  0xd8   :  { %v446_v52 = vpop.f32.mrf.mxu0  ;;  %v1489_v49 = vpop.f32.mrf.mxu1 }
  0xd9   :  { %v749_v54 = vadd.f32 %v686_v50, %v685_v48  ;;  %v447_v55 = vadd.f32 %v1437_v41, %v446_v52  ;;  %v691_v9 = vmax.f32 %v455_v62, 0.0 }
  0xda   :  { %v1102_v56 = vpop.f32.mrf.mxu0 }
  0xdb   :  { %v750_v58 = vadd.f32 %v749_v54, %v687_v53  ;;  %v689_v63 = vmax.f32 %v447_v55, 0.0  ;;  %v458_v4 = vadd.f32 %v1102_v56, %v1437_v41  ;;  %v1492_v56 = vpop.f32.mrf.mxu1 }
  0xdc   :  { %v449_v60 = vpop.f32.mrf.mxu0 }
  0xdd   :  { %v751_v0 = vadd.f32 %v750_v58, %v688_v57  ;;  %v450_v1 = vadd.f32 %v1437_v41, %v449_v60  ;;  %v692_v13 = vmax.f32 %v458_v4, 0.0 }
  0xde   :  { %v1105_v2 = vpop.f32.mrf.mxu0 }
  0xdf   :  { %v752_v3 = vadd.f32 %v751_v0, %v689_v63  ;;  %v690_v5 = vmax.f32 %v450_v1, 0.0  ;;  %v471_v18 = vadd.f32 %v1105_v2, %v1437_v41 }
  0xe0   :  { %v462_v7 = vpop.f32.mrf.mxu0 }
  0xe1   :  { %v753_v10 = vadd.f32 %v752_v3, %v690_v5  ;;  %v463_v11 = vadd.f32 %v1437_v41, %v462_v7  ;;  %v695_v29 = vmax.f32 %v471_v18, 0.0  ;;  %v1497_v3 = vpop.f32.mrf.mxu1 }
  0xe2   :  { %v1106_v12 = vpop.f32.mrf.mxu0 }
  0xe3   :  { %v754_v14 = vadd.f32 %v753_v10, %v691_v9  ;;  %v693_v19 = vmax.f32 %v463_v11, 0.0  ;;  %v474_v25 = vadd.f32 %v1106_v12, %v1437_v41  ;;  %v1500_v12 = vpop.f32.mrf.mxu1 }
  0xe4   :  { %v465_v16 = vpop.f32.mrf.mxu0 }
  0xe5   :  { %v755_v20 = vadd.f32 %v754_v14, %v692_v13  ;;  %v466_v21 = vadd.f32 %v1437_v41, %v465_v16  ;;  %v696_v34 = vmax.f32 %v474_v25, 0.0 }
  0xe6   :  { %v1109_v23 = vpop.f32.mrf.mxu0 }
  0xe7   :  { %v756_v24 = vadd.f32 %v755_v20, %v693_v19  ;;  %v694_v26 = vmax.f32 %v466_v21, 0.0  ;;  %v487_v39 = vadd.f32 %v1109_v23, %v1437_v41  ;;  %v1505_v23 = vpop.f32.mrf.mxu1 }
  0xe8   :  { %v478_v27 = vpop.f32.mrf.mxu0 }
  0xe9   :  { %v757_v30 = vadd.f32 %v756_v24, %v694_v26  ;;  %v479_v31 = vadd.f32 %v1437_v41, %v478_v27  ;;  %v699_v37 = vmax.f32 %v487_v39, 0.0  ;;  %v1508_v32 = vpop.f32.mrf.mxu1 }
  0xea   :  { %v1110_v33 = vpop.f32.mrf.mxu0 }
  0xeb   :  { %v758_v35 = vadd.f32 %v757_v30, %v695_v29  ;;  %v697_v40 = vmax.f32 %v479_v31, 0.0  ;;  %v490_v46 = vadd.f32 %v1110_v33, %v1437_v41 }
  0xec   :  { %v481_v36 = vpop.f32.mrf.mxu0 }
  0xed   :  { %v759_v42 = vadd.f32 %v758_v35, %v696_v34  ;;  %v482_v43 = vadd.f32 %v1437_v41, %v481_v36  ;;  %v700_v53 = vmax.f32 %v490_v46, 0.0 }
  0xee   :  { %v1113_v44 = vpop.f32.mrf.mxu0 }
  0xef   :  { %v760_v45 = vadd.f32 %v759_v42, %v697_v40  ;;  %v698_v47 = vmax.f32 %v482_v43, 0.0  ;;  %v503_v57 = vadd.f32 %v1113_v44, %v1437_v41 }
  0xf0   :  { %v494_v48 = vpop.f32.mrf.mxu0 }
  0xf1   :  { %v761_v50 = vadd.f32 %v760_v45, %v698_v47  ;;  %v495_v51 = vadd.f32 %v1437_v41, %v494_v48  ;;  %v703_v4 = vmax.f32 %v503_v57, 0.0  ;;  %v1513_v45 = vpop.f32.mrf.mxu1 }
  0xf2   :  { %v1114_v52 = vpop.f32.mrf.mxu0 }
  0xf3   :  { %v762_v54 = vadd.f32 %v761_v50, %v699_v37  ;;  %v701_v58 = vmax.f32 %v495_v51, 0.0  ;;  %v506_v0 = vadd.f32 %v1114_v52, %v1437_v41 }
  0xf4   :  { %v497_v55 = vpop.f32.mrf.mxu0 }
  0xf5   :  { %v763_v59 = vadd.f32 %v762_v54, %v700_v53  ;;  %v498_v60 = vadd.f32 %v1437_v41, %v497_v55  ;;  %v704_v9 = vmax.f32 %v506_v0, 0.0  ;;  %v1516_v53 = vpop.f32.mrf.mxu1 }
  0xf6   :  { %v1117_v62 = vpop.f32.mrf.mxu0 }
  0xf7   :  { %v764_v63 = vadd.f32 %v763_v59, %v701_v58  ;;  %v702_v1 = vmax.f32 %v498_v60, 0.0  ;;  %v519_v13 = vadd.f32 %v1117_v62, %v1437_v41 }
  0xf8   :  { %v510_v2 = vpop.f32.mrf.mxu0 }
  0xf9   :  { %v765_v5 = vadd.f32 %v764_v63, %v702_v1  ;;  %v511_v6 = vadd.f32 %v1437_v41, %v510_v2  ;;  %v707_v24 = vmax.f32 %v519_v13, 0.0  ;;  %v622_v1 = vpop.f32.mrf.mxu1 }
  0xfa   :  { %v1118_v7 = vpop.f32.mrf.mxu0 }
  0xfb   :  { %v766_v10 = vadd.f32 %v765_v5, %v703_v4  ;;  %v705_v14 = vmax.f32 %v511_v6, 0.0  ;;  %v522_v20 = vadd.f32 %v1118_v7, %v1437_v41 }
  0xfc   :  { %v513_v11 = vpop.f32.mrf.mxu0 }
  0xfd   :  { %v767_v15 = vadd.f32 %v766_v10, %v704_v9  ;;  %v514_v16 = vadd.f32 %v1437_v41, %v513_v11  ;;  %v708_v29 = vmax.f32 %v522_v20, 0.0  ;;  %v1146_v11 = vpop.f32.mrf.mxu1 }
  0xfe   :  { %v1121_v18 = vpop.f32.mrf.mxu0 }
  0xff   :  { %v768_v19 = vadd.f32 %v767_v15, %v705_v14  ;;  %v706_v21 = vmax.f32 %v514_v16, 0.0  ;;  %v535_v33 = vadd.f32 %v1121_v18, %v1437_v41  ;;  %v625_v20 = vpop.f32.mrf.mxu1 }
 0x100   :  { %v526_v22 = vpop.f32.mrf.mxu0 }
 0x101   :  { %v769_v25 = vadd.f32 %v768_v19, %v706_v21  ;;  %v527_v26 = vadd.f32 %v1437_v41, %v526_v22  ;;  %v711_v46 = vmax.f32 %v535_v33, 0.0  ;;  %v575_v22 = vadd.f32 %v1437_v41, %v1460_v8 }
 0x102   :  { %v1122_v27 = vpop.f32.mrf.mxu0 }
 0x103   :  { %v770_v30 = vadd.f32 %v769_v25, %v707_v24  ;;  %v709_v34 = vmax.f32 %v527_v26, 0.0  ;;  %v538_v42 = vadd.f32 %v1122_v27, %v1437_v41  ;;  %v578_v27 = vadd.f32 %v1437_v41, %v1477_v28 }
 0x104   :  { %v529_v31 = vpop.f32.mrf.mxu0  ;;  %v594_v28 = vadd.f32 %v1437_v41, %v1497_v3  ;;  %v610_v3 = vadd.f32 %v1437_v41, %v1513_v45  ;;  %v626_v45 = vadd.f32 %v1437_v41, %v625_v20 }
 0x105   :  { %v771_v35 = vadd.f32 %v770_v30, %v708_v29  ;;  %v530_v36 = vadd.f32 %v1437_v41, %v529_v31  ;;  %v712_v50 = vmax.f32 %v538_v42, 0.0  ;;  %v1149_v29 = vpop.f32.mrf.mxu1  ;;  %v583_v30 = vadd.f32 %v1451_v61, %v1437_v41 }
 0x106   :  { %v1125_v39 = vpop.f32.mrf.mxu0  ;;  %v721_v31 = vmax.f32 %v575_v22, 0.0  ;;  %v591_v42 = vadd.f32 %v1437_v41, %v1489_v49  ;;  %v599_v61 = vadd.f32 %v1484_v38, %v1437_v41  ;;  %v607_v49 = vadd.f32 %v1437_v41, %v1505_v23 }
 0x107   :  { %v772_v40 = vadd.f32 %v771_v35, %v709_v34  ;;  %v710_v43 = vmax.f32 %v530_v36, 0.0  ;;  %v551_v54 = vadd.f32 %v1125_v39, %v1437_v41  ;;  %v586_v34 = vadd.f32 %v1467_v17, %v1437_v41  ;;  %v638_v39 = vpop.f32.mrf.mxu1 }
 0x108   :  { %v542_v44 = vpop.f32.mrf.mxu0  ;;  %v722_v35 = vmax.f32 %v578_v27, 0.0  ;;  %v615_v38 = vadd.f32 %v1500_v12, %v1437_v41  ;;  %v623_v23 = vadd.f32 %v1437_v41, %v622_v1  ;;  %v631_v12 = vadd.f32 %v1516_v53, %v1437_v41 }
 0x109   :  { %v773_v47 = vadd.f32 %v772_v40, %v710_v43  ;;  %v543_v48 = vadd.f32 %v1437_v41, %v542_v44  ;;  %v715_v2 = vmax.f32 %v551_v54, 0.0  ;;  %v723_v40 = vmax.f32 %v583_v30, 0.0 }
 0x10a   :  { %v1126_v37 = vpop.f32.mrf.mxu0  ;;  %v724_v43 = vmax.f32 %v586_v34, 0.0 }
 0x10b   :  { %v774_v51 = vadd.f32 %v773_v47, %v711_v46  ;;  %v713_v55 = vmax.f32 %v543_v48, 0.0  ;;  %v554_v62 = vadd.f32 %v1126_v37, %v1437_v41  ;;  %v1150_v46 = vpop.f32.mrf.mxu1  ;;  %v725_v47 = vmax.f32 %v591_v42, 0.0 }
 0x10c   :  { %v545_v52 = vpop.f32.mrf.mxu0  ;;  %v602_v37 = vadd.f32 %v1492_v56, %v1437_v41  ;;  %v618_v56 = vadd.f32 %v1508_v32, %v1437_v41  ;;  %v734_v32 = vmax.f32 %v626_v45, 0.0  ;;  %v650_v30 = vadd.f32 %v1150_v46, %v1437_v41 }
 0x10d   :  { %v775_v57 = vadd.f32 %v774_v51, %v712_v50  ;;  %v546_v58 = vadd.f32 %v1437_v41, %v545_v52  ;;  %v716_v6 = vmax.f32 %v554_v62, 0.0  ;;  %v726_v50 = vmax.f32 %v594_v28, 0.0  ;;  %v641_v51 = vpop.f32.mrf.mxu1 }
 0x10e   :  { %v1129_v59 = vpop.f32.mrf.mxu0  ;;  %v727_v52 = vmax.f32 %v599_v61, 0.0 }
 0x10f   :  { %v776_v60 = vadd.f32 %v775_v57, %v713_v55  ;;  %v714_v63 = vmax.f32 %v546_v58, 0.0  ;;  %v567_v14 = vadd.f32 %v1129_v59, %v1437_v41  ;;  %v728_v55 = vmax.f32 %v602_v37, 0.0  ;;  %v1153_v58 = vpop.f32.mrf.mxu1 }
 0x110   :  { %v558_v0 = vpop.f32.mrf.mxu0  ;;  %v729_v59 = vmax.f32 %v607_v49, 0.0  ;;  %v663_v42 = vadd.f32 %v1153_v58, %v1437_v41 }
 0x111   :  { %v777_v4 = vadd.f32 %v776_v60, %v714_v63  ;;  %v559_v9 = vadd.f32 %v1437_v41, %v558_v0  ;;  %v719_v21 = vmax.f32 %v567_v14, 0.0  ;;  %v730_v63 = vmax.f32 %v610_v3, 0.0  ;;  %v654_v0 = vpop.f32.mrf.mxu1 }
 0x112   :  { %v1130_v5 = vpop.f32.mrf.mxu0 }
 0x113   :  { %v778_v7 = vadd.f32 %v777_v4, %v715_v2  ;;  %v717_v16 = vmax.f32 %v559_v9, 0.0  ;;  %v570_v18 = vadd.f32 %v1130_v5, %v1437_v41  ;;  %v731_v2 = vmax.f32 %v615_v38, 0.0 }
 0x114   :  { %v561_v10 = vpop.f32.mrf.mxu0  ;;  %v732_v5 = vmax.f32 %v618_v56, 0.0  ;;  %v733_v9 = vmax.f32 %v623_v23, 0.0 }
 0x115   :  { %v1522_v13 = vadd.f32 %v778_v7, %v716_v6  ;;  %v562_v15 = vadd.f32 %v1437_v41, %v561_v10  ;;  %v720_v25 = vmax.f32 %v570_v18, 0.0  ;;  %v1154_v7 = vpop.f32.mrf.mxu1  ;;  %v735_v18 = vmax.f32 %v631_v12, 0.0 }
 0x116   :  { %v666_v28 = vadd.f32 %v1154_v7, %v1437_v41 }
 0x117   :  { %v718_v19 = vmax.f32 %v562_v15, 0.0  ;;  %v634_v15 = vadd.f32 %v1146_v11, %v1437_v41 }
 0x118   :  { %v744_v37 = vmax.f32 %v666_v28, 0.0 }
 0x119   :  { %v786_v24 = vadd.f32 %v718_v19, %v717_v16  ;;  %v657_v16 = vpop.f32.mrf.mxu1  ;;  %v736_v1 = vmax.f32 %v634_v15, 0.0  ;;  %v1036_v15 = vld [vmem:[%s1580_s4] ss:$0 sm:$0xff] }
 0x11b   :  { %v787_v26 = vadd.f32 %v786_v24, %v719_v21  ;;  %v639_v21 = vadd.f32 %v1437_v41, %v638_v39  ;;  %v642_v24 = vadd.f32 %v1437_v41, %v641_v51  ;;  %v1157_v20 = vpop.f32.mrf.mxu1 }
 0x11d   :  { %v788_v33 = vadd.f32 %v787_v26, %v720_v25  ;;  %v647_v25 = vadd.f32 %v1149_v29, %v1437_v41  ;;  %v737_v26 = vmax.f32 %v639_v21, 0.0  ;;  %v670_v11 = vpop.f32.mrf.mxu1 }
 0x11f   :  { %v789_v36 = vadd.f32 %v788_v33, %v721_v31  ;;  %v738_v31 = vmax.f32 %v642_v24, 0.0  ;;  %v739_v33 = vmax.f32 %v647_v25, 0.0 }
 0x121   :  { %v790_v8 = vadd.f32 %v789_v36, %v722_v35  ;;  %v655_v35 = vadd.f32 %v1437_v41, %v654_v0  ;;  %v740_v36 = vmax.f32 %v650_v30, 0.0 }
 0x123   :  { %v791_v44 = vadd.f32 %v790_v8, %v723_v40  ;;  %v658_v40 = vadd.f32 %v1437_v41, %v657_v16  ;;  %v1158_v8 = vpop.f32.mrf.mxu1 }
 0x124   :  { %v682_v3 = vadd.f32 %v1158_v8, %v1437_v41 }
 0x125   :  { %v792_v48 = vadd.f32 %v791_v44, %v724_v43  ;;  %v741_v43 = vmax.f32 %v655_v35, 0.0  ;;  %v742_v61 = vmax.f32 %v658_v40, 0.0  ;;  %v673_v46 = vpop.f32.mrf.mxu1 }
 0x126   :  { %v674_v51 = vadd.f32 %v1437_v41, %v673_v46 }
 0x127   :  { %v793_v17 = vadd.f32 %v792_v48, %v725_v47  ;;  %v743_v47 = vmax.f32 %v663_v42, 0.0 }
 0x128   :  { %v746_v58 = vmax.f32 %v674_v51, 0.0 }
 0x129   :  { %v794_v54 = vadd.f32 %v793_v17, %v726_v50  ;;  %v671_v17 = vadd.f32 %v1437_v41, %v670_v11 }
 0x12b   :  { %v795_v57 = vadd.f32 %v794_v54, %v727_v52  ;;  %v780_v52 = vrot.slane %v1522_v13, 4  ;;  %v679_v54 = vadd.f32 %v1157_v20, %v1437_v41  ;;  %v745_v49 = vmax.f32 %v671_v17, 0.0 }
 0x12d   :  { %v796_v60 = vadd.f32 %v795_v57, %v728_v55  ;;  %v781_v38 = vadd.f32 %v780_v52, %v1522_v13 }
 0x12f   :  { %v797_v62 = vadd.f32 %v796_v60, %v729_v59  ;;  %v747_v59 = vmax.f32 %v679_v54, 0.0 }
 0x131   :  { %v798_v4 = vadd.f32 %v797_v62, %v730_v63  ;;  %v748_v62 = vmax.f32 %v682_v3, 0.0  ;;  %v782_v63 = vrot.slane %v781_v38, 2 }
 0x133   :  { %v799_v6 = vadd.f32 %v798_v4, %v731_v2  ;;  %v783_v4 = vadd.f32 %v782_v63, %v781_v38 }
 0x135   :  { %v800_v10 = vadd.f32 %v799_v6, %v732_v5  ;;  %v784_v6 = vrot.slane %v783_v4, 1 }
 0x137   :  { %v801_v14 = vadd.f32 %v800_v10, %v733_v9  ;;  %v785_v12 = vadd.f32 %v784_v6, %v783_v4 }
 0x139   :  { %v802_v19 = vadd.f32 %v801_v14, %v734_v32 }
 0x13b   :  { %v803_v22 = vadd.f32 %v802_v19, %v735_v18 }
 0x13d   :  { %v804_v53 = vadd.f32 %v803_v22, %v736_v1 }
 0x13f   :  { %v805_v27 = vadd.f32 %v804_v53, %v737_v26 }
 0x141   :  { %v806_v34 = vadd.f32 %v805_v27, %v738_v31 }
 0x143   :  { %v807_v39 = vadd.f32 %v806_v34, %v739_v33 }
 0x145   :  { %v808_v29 = vadd.f32 %v807_v39, %v740_v36 }
 0x147   :  { %v809_v44 = vadd.f32 %v808_v29, %v741_v43 }
 0x149   :  { %v810_v48 = vadd.f32 %v809_v44, %v742_v61 }
 0x14b   :  { %v811_v50 = vadd.f32 %v810_v48, %v743_v47 }
 0x14d   :  { %v812_v55 = vadd.f32 %v811_v50, %v744_v37 }
 0x14f   :  { %v813_v57 = vadd.f32 %v812_v55, %v745_v49 }
 0x151   :  { %v814_v60 = vadd.f32 %v813_v57, %v746_v58 }
 0x153   :  { %v815_v56 = vadd.f32 %v814_v60, %v747_v59 }
 0x155   :  { %v816_v0 = vadd.f32 %v815_v56, %v748_v62 }
 0x157   :  { %v817_v2 = vrot.slane %v816_v0, 4 }
 0x159   :  { %v818_v23 = vadd.f32 %v817_v2, %v816_v0 }
 0x15b   :  { %v819_v5 = vrot.slane %v818_v23, 2 }
 0x15d   :  { %v820_v45 = vadd.f32 %v819_v5, %v818_v23 }
 0x15f   :  { %v821_v7 = vrot.slane %v820_v45, 1 }
 0x161   :  { %v822_v9 = vadd.f32 %v821_v7, %v820_v45 }
 0x163   :  { %v826_v41 = vsel %vm825_vm3, %v822_v9, %v785_v12 }
 0x164   :  { %828 = vst [vmem:[#allocation2] sm:$0x3] %v826_v41 }
 0x16b   :  { %v833_v10 = vld [vmem:[#allocation2] sm:$0x3] }
 0x16c   :  { %v834_v13 = vmul.f32 0.00390625, %v833_v10 }
 0x16e   :  { %v835_v14 = vpack.c.bf16 %v834_v13, %v834_v13 }
 0x170   :  { %1176 = vmatmul.mubr.bf16.vlgmr.msra.gmra.mxu1 %v835_v14 }
 0x230   :  { %v941_v32 = vpop.f32.mrf.mxu1 }
 0x231   :  { %v942_v16 = vadd.f32 %v1036_v15, %v941_v32 }
 0x232   :  { %v1177_v18 = vpop.f32.mrf.mxu1 }
 0x233   :  { %947 = vst [vmem:[#allocation3] sm:$0x3] %v942_v16 }
 0x234   :  { %v944_v19 = vpop.f32.mrf.mxu1 }
 0x235   :  { %1244 = shalt.err (!%p1241_p4)
}
 0x236   :  { %957 = dma.vmem_to_hbm [thread:$0]  %s955_s28, 32, %s1581_s5, [#allocation4]   ;;  %v1178_v21 = vpop.f32.mrf.mxu1 }
 0x237   :  { %1253 = dma.done.wait [#allocation4], 32  }
 0x238   :  { %1254 = vsyncadd [#allocation4], 4294967264 }
 0x239   :  { %961 = vsyncpa [#allocation4], 1 }

</bundles_post_ra>
